<compile_context>
chip_gen: v5e
topology: v5e:2x2
jax: 0.10.0
libtpu: 0.0.40
codegen_flags: <defaults>
</compile_context>

<pallas_src>
import jax
import jax.numpy as jnp
from jax.experimental import pallas as pl
from jax.experimental.pallas import tpu as pltpu

_SUBLANE = 8


def _round_up(x, m):
    return (x + m - 1) // m * m


def _vmem_capacity_bytes():
    """Physical VMEM of the current generation; assume the smallest (v7x, 64 MiB)
    when the query is unavailable."""
    try:
        return int(pltpu.get_tpu_info().vmem_capacity_bytes)
    except Exception:
        return 64 * 1024 * 1024


def _tile_footprint_bytes(tb, H, O, itemsize=4):
    # double-buffered x tile + double-buffered out tile
    # + weight/bias (counted x2 conservatively; they are grid-invariant).
    return (2 * tb * H + 2 * tb * O + 2 * (H * O + O)) * itemsize


def classifier_kernel(x_ref, w_ref, b_ref, o_ref):
    # x_ref: (TB, H)   w_ref: (H, O)   b_ref: (1, O)   o_ref: (TB, O)
    y = jnp.dot(x_ref[...], w_ref[...], preferred_element_type=jnp.float32)
    y = y + b_ref[...]
    # sigmoid(y) == 0.5 * (tanh(y / 2) + 1): one EUP transcendental, exact to f32.
    o_ref[...] = (0.5 * (jnp.tanh(0.5 * y) + 1.0)).astype(o_ref.dtype)


def prepare_classifier_params(weight, bias):
    """One-time parameter preparation (hoist out of the per-step forward).

    PyTorch nn.Linear stores weight as (output, hidden); keep the transpose
    (hidden, output) and bias as a (1, output) row so the per-call wrapper does no
    weight-side reshapes, transposes or pads."""
    w_t = jnp.asarray(weight).T                    # (H, O)
    b2d = jnp.asarray(bias).reshape(1, -1)         # (1, O)
    return w_t, b2d


def classifier_forward(prev_h, weight_t, bias_2d, *, max_block_rows=2048):
    """prev_h: (B, H) f32, weight_t: (H, O) f32, bias_2d: (1, O) f32 -> (B, O) f32."""
    B, H = prev_h.shape
    H2, O = weight_t.shape
    assert H == H2 and bias_2d.shape == (1, O)

    capacity = _vmem_capacity_bytes()
    budget = (capacity * 3) // 4                   # headroom for compiler scratch/spill

    # Guard: the VMEM-resident weight design must fit W plus at least one 8-row
    # tile pair.  TODO(synk): add an O/K-tiled fallback (output grid axis + f32
    # accumulator over a K axis) for classifier heads larger than VMEM.
    if _tile_footprint_bytes(_SUBLANE, H, O) > budget:
        raise NotImplementedError(
            "Classifier head too large for the VMEM-resident weight design; "
            "an output/reduction-tiled variant is required.")

    # Pad the batch only to the 8-row sublane granule (no-op when B % 8 == 0),
    # never to a multiple of the tile size.
    B_pad = _round_up(max(B, _SUBLANE), _SUBLANE)
    x = prev_h if B_pad == B else jnp.pad(prev_h, ((0, B_pad - B), (0, 0)))

    # Batch tile: multiple of 8, aim for >= 2 grid steps (both v7x TensorCores get
    # work under "parallel"), cap by max_block_rows, shrink until the pipelined
    # working set fits the generation-aware VMEM budget.
    TB = min(max_block_rows, _round_up(pl.cdiv(B_pad, 2), _SUBLANE), B_pad)
    TB = max(TB, _SUBLANE)
    while TB > _SUBLANE and _tile_footprint_bytes(TB, H, O) > budget:
        TB = max(_SUBLANE, _round_up(TB // 2, _SUBLANE))

    grid = (pl.cdiv(B_pad, TB),)

    out = pl.pallas_call(
        classifier_kernel,
        out_shape=jax.ShapeDtypeStruct((B_pad, O), jnp.float32),
        grid=grid,
        in_specs=[
            pl.BlockSpec((TB, H), lambda i: (i, 0)),   # activations: stream per tile
            pl.BlockSpec((H, O), lambda i: (0, 0)),    # weight: VMEM-resident
            pl.BlockSpec((1, O), lambda i: (0, 0)),    # bias:   VMEM-resident
        ],
        out_specs=pl.BlockSpec((TB, O), lambda i: (i, 0)),
        compiler_params=pltpu.CompilerParams(
            dimension_semantics=("parallel",),         # megacore-shardable on v7x
            vmem_limit_bytes=budget,                   # generation-aware budget
        ),
    )(x, weight_t, bias_2d)

    # Strip the (at most 7-row) sublane pad; no-op when B was already aligned.
    return out if B_pad == B else out[:B]


if __name__ == "__main__":
    # Small shapes consistent with the module: opt.hidden_size=32, opt.output_size=8
    batch = 2
    hidden_size = 32
    output_size = 8
    init_weight = 0.1  # opt.init_weight

    key = jax.random.PRNGKey(0)
    k_x, k_w, k_b = jax.random.split(key, 3)

    # Input activations
    prev_h = jax.random.normal(k_x, (batch, hidden_size), dtype=jnp.float32)

    # Deterministic parameter init mimicking init.uniform_(-init_weight, init_weight).
    # PyTorch nn.Linear weight is (output, hidden).
    weight = jax.random.uniform(
        k_w, (output_size, hidden_size), dtype=jnp.float32,
        minval=-init_weight, maxval=init_weight)
    bias = jax.random.uniform(
        k_b, (output_size,), dtype=jnp.float32,
        minval=-init_weight, maxval=init_weight)

    # One-time parameter prep (hoisted out of the forward pass).
    weight_t, bias_2d = prepare_classifier_params(weight, bias)

    pred = classifier_forward(prev_h, weight_t, bias_2d)
    pred = jax.block_until_ready(pred)

    # Reference check in plain JAX.
    ref = jax.nn.sigmoid(prev_h @ weight.T + bias)
    assert pred.shape == (batch, output_size)
    assert jnp.allclose(pred, ref, atol=1e-5, rtol=1e-5)

    print("KERNEL_OK")
</pallas_src>

<mosaic_0001>
module attributes {stable_mosaic.version = 11 : i64} {
  func.func @classifier_kernel(%arg0: i32, %arg1: memref<8x32xf32, #tpu.memory_space<vmem>>, %arg2: memref<32x8xf32, #tpu.memory_space<vmem>>, %arg3: memref<1x8xf32, #tpu.memory_space<vmem>>, %arg4: memref<8x8xf32, #tpu.memory_space<vmem>>) attributes {dimension_semantics = [#tpu.dimension_semantics<parallel>], iteration_bounds = array<i64: 1>, scalar_prefetch = 0 : i64, scratch_operands = 0 : i64, tpu.core_type = #tpu.core_type<tc>, window_params = [{transform_indices = @transform_0, window_bounds = array<i64: 8, 32>}, {pipeline_mode = #tpu.pipeline_mode<synchronous>, transform_indices = @transform_1, window_bounds = array<i64: 32, 8>}, {pipeline_mode = #tpu.pipeline_mode<synchronous>, transform_indices = @transform_2, window_bounds = array<i64: 1, 8>}, {transform_indices = @transform_3, window_bounds = array<i64: 8, 8>}]} {
    %c0 = arith.constant 0 : index
    %c0_0 = arith.constant 0 : index
    %0 = vector.load %arg1[%c0, %c0_0] : memref<8x32xf32, #tpu.memory_space<vmem>>, vector<8x32xf32>
    %c0_1 = arith.constant 0 : index
    %c0_2 = arith.constant 0 : index
    %1 = vector.load %arg2[%c0_1, %c0_2] : memref<32x8xf32, #tpu.memory_space<vmem>>, vector<32x8xf32>
    %cst = arith.constant dense<0.000000e+00> : vector<8x8xf32>
    %2 = tpu.matmul %0, %1, %cst {dimension_numbers = #tpu.dot_dimension_numbers<[1], [0], [0], [1], [0, 0, 1, 1], [], []>} : vector<8x32xf32>, vector<32x8xf32>, vector<8x8xf32> -> vector<8x8xf32>
    %c0_3 = arith.constant 0 : index
    %c0_4 = arith.constant 0 : index
    %3 = vector.load %arg3[%c0_3, %c0_4] : memref<1x8xf32, #tpu.memory_space<vmem>>, vector<1x8xf32>
    %4 = vector.broadcast %3 : vector<1x8xf32> to vector<8x8xf32>
    %5 = arith.addf %2, %4 : vector<8x8xf32>
    %cst_5 = arith.constant 5.000000e-01 : f32
    %6 = vector.broadcast %cst_5 : f32 to vector<8x8xf32>
    %7 = arith.mulf %6, %5 : vector<8x8xf32>
    %8 = math.tanh %7 : vector<8x8xf32>
    %cst_6 = arith.constant 1.000000e+00 : f32
    %9 = vector.broadcast %cst_6 : f32 to vector<8x8xf32>
    %10 = arith.addf %8, %9 : vector<8x8xf32>
    %cst_7 = arith.constant 5.000000e-01 : f32
    %11 = vector.broadcast %cst_7 : f32 to vector<8x8xf32>
    %12 = arith.mulf %11, %10 : vector<8x8xf32>
    %c0_8 = arith.constant 0 : index
    %c0_9 = arith.constant 0 : index
    %13 = vector.load %arg4[%c0_8, %c0_9] : memref<8x8xf32, #tpu.memory_space<vmem>>, vector<8x8xf32>
    tpu.vector_store %arg4[%c0_8, %c0_9], %12 {strides = array<i32>} : memref<8x8xf32, #tpu.memory_space<vmem>>, vector<8x8xf32>,
    return
  }
  func.func @transform_0(%arg0: i32) -> (i32, i32) {
    %c0_i32 = arith.constant 0 : i32
    %c0_i32_0 = arith.constant 0 : i32
    return %arg0, %c0_i32 : i32, i32
  }
  func.func @transform_1(%arg0: i32) -> (i32, i32) {
    %c0_i32 = arith.constant 0 : i32
    %c0_i32_0 = arith.constant 0 : i32
    %c0_i32_1 = arith.constant 0 : i32
    return %c0_i32, %c0_i32_0 : i32, i32
  }
  func.func @transform_2(%arg0: i32) -> (i32, i32) {
    %c0_i32 = arith.constant 0 : i32
    %c0_i32_0 = arith.constant 0 : i32
    %c0_i32_1 = arith.constant 0 : i32
    return %c0_i32, %c0_i32_0 : i32, i32
  }
  func.func @transform_3(%arg0: i32) -> (i32, i32) {
    %c0_i32 = arith.constant 0 : i32
    %c0_i32_0 = arith.constant 0 : i32
    return %arg0, %c0_i32 : i32, i32
  }
}

</mosaic_0001>

<bundles_post_ra>
// kernel: tpu_custom_call.1
= control target key start
LH: loop header
LB: loop body
LE: loop exit
PB: predicated region body
PF: predicated region fallthrough
CT: control target
= control target key end

     0   :  { %s143_s0 = inlined_call_operand.vmem [shape: f32[8,32], index: 0, kind: input, shape index: {}]   ;;  %s144_s1 = inlined_call_operand.vmem [shape: f32[32,8], index: 1, kind: input, shape index: {}]   ;;  %s145_s2 = inlined_call_operand.vmem [shape: f32[1,8], index: 2, kind: input, shape index: {}]   ;;  %s146_s3 = inlined_call_operand.hbm [shape: f32[8,8], index: 3, kind: output, shape index: {}]  }
   0x1   :  { %v19_v0 = vld [vmem:[%s144_s1 + $0x18] sm:$0xff]  ;;  %v18_v1 = vld [vmem:[%s144_s1 + $0x10] sm:$0xff]  ;;  %v17_v2 = vld [vmem:[%s144_s1 + $0x8] sm:$0xff] }
   0x2   :  { %40 = vmatpush.msra.mxu0 %v19_v0 }
   0x3   :  { %8 = vsyncpa [#allocation3], 0  ;;  %v16_v3 = vld [vmem:[%s144_s1] sm:$0xff]  ;;  %vm24_vm0 = vcmask 261120   ;;  %s101_s24 = smov [#allocation2]   ;;  %s61_s27 = sshll.u32 %s146_s3, 4  ;;  %s62_s27 = int_to_ptr.hbm [resolvable:$true] %s61_s27 }
   0x4   :  { %41 = vmatpush.msra.mxu0 %v18_v1  ;;  %v15_v4 = vld [vmem:[%s143_s0] sm:$0xff]  ;;  %s59_s25 = sshll.u32 %s101_s24, 4  ;;  %vm52_vm1 = vcmask 64512   ;;  %s60_s25 = int_to_ptr.vmem [resolvable:$true] %s59_s25 }
   0x5   :  { %v72_v5 = vld [vmem:[%s145_s2] ss:$0 sm:$0xff] }
   0x6   :  { %42 = vmatpush.msra.mxu0 %v17_v2 }
   0x8   :  { %43 = vmatpush.msra.mxu0 %v16_v3 }
   0x9   :  { %70 = vmatmul.msk.f32.vlgmr.msra.gmra.mxu0 %vm24_vm0, %v15_v4 }
  0x86   :  { %v45_v6 = vpop.f32.mrf.mxu0 }
  0x87   :  { %v46_v7 = vadd.f32 %v72_v5, %v45_v6 }
  0x89   :  { %v48_v8 = vmul.f32 0.5, %v46_v7 }
  0x8b   :  { %73 = vtanh.f32 %v48_v8 }
  0x91   :  { %v74_v9 = vpop.eup %73 }
  0x92   :  { %v50_v10 = vadd.f32 1.0, %v74_v9 }
  0x94   :  { %v51_v11 = vmul.f32 0.5, %v50_v10 }
  0x96   :  { %53 = vst.msk [vmem:[#allocation2] sm:$0xff] %vm52_vm1, %v51_v11 }
  0x97   :  { %64 = dma.vmem_to_hbm [thread:$0]  %s60_s25, 128, %s62_s27, [#allocation3]  }
  0x98   :  { %99 = dma.done.wait [#allocation3], 128  }
  0x99   :  { %100 = vsyncadd [#allocation3], 4294967168 }
  0x9a   :  { %69 = vsyncpa [#allocation3], 1 }

</bundles_post_ra>
